<compile_context>
chip_gen: v7x
topology: tpu7x:2x2x1
jax: 0.10.0
libtpu: 0.0.40
codegen_flags: <defaults>
</compile_context>

<pallas_src>
import jax
import jax.numpy as jnp
from jax.experimental import pallas as pl
from jax.experimental.pallas import tpu as pltpu

_EPS = 1e-5
_LANE = 128


def _round_up(n, m):
    return (n + m - 1) // m * m


# ----------------------------------------------------------------------------
# Fused bottleneck kernel
# ----------------------------------------------------------------------------
def _make_bottleneck_kernel(has_res, tb, lp, medp):
    rows = tb * lp

    def kernel(*refs):
        if has_res:
            (x_ref, w1_ref, b1_ref, w2_ref, b2_ref,
             w3_ref, b3_ref, wr_ref, br_ref, o_ref) = refs
        else:
            (x_ref, w1_ref, b1_ref, w2_ref, b2_ref,
             w3_ref, b3_ref, o_ref) = refs

        cin = x_ref.shape[-1]
        out_c = o_ref.shape[-1]

        xs_f32 = x_ref[...].reshape(rows, cin)            # (rows, Cin) f32
        xs = xs_f32.astype(jnp.bfloat16)                  # single in-kernel cast

        # -- conv1 (1x1, stride applied outside) + folded BN + ReLU ----------
        h1 = jnp.dot(xs, w1_ref[...], preferred_element_type=jnp.float32)
        h1 = jnp.maximum(h1 + b1_ref[...], 0.0)           # (rows, MedP) f32

        # -- conv2 (k=3, pad=1) + folded BN + ReLU, ONE K=3*MedP MXU pass ----
        # Row r of the flattened slab is (batch b, position i), i = r % lp.
        # The +/-1 shifted operands come from XLU rotates; wrapped rows and
        # cross-batch rows are masked to zero (the conv's zero padding).
        pos = jax.lax.broadcasted_iota(jnp.int32, (rows, medp), 0) % lp
        prev = jnp.where(pos == 0, 0.0, pltpu.roll(h1, shift=1, axis=0))
        nxt = jnp.where(pos == lp - 1, 0.0,
                        pltpu.roll(h1, shift=rows - 1, axis=0))
        x2 = jnp.concatenate([prev, h1, nxt], axis=-1).astype(jnp.bfloat16)
        h2 = jnp.dot(x2, w2_ref[...], preferred_element_type=jnp.float32)
        h2 = jnp.maximum(h2 + b2_ref[...], 0.0)           # (rows, MedP) f32

        # -- conv3 (1x1) + folded BN + ReLU -----------------------------------
        h3 = jnp.dot(h2.astype(jnp.bfloat16), w3_ref[...],
                     preferred_element_type=jnp.float32)
        h3 = jnp.maximum(h3 + b3_ref[...], 0.0)           # (rows, Out) f32

        # -- residual branch (stays in VMEM / vregs) --------------------------
        if has_res:
            res = jnp.dot(xs, wr_ref[...],
                          preferred_element_type=jnp.float32) + br_ref[...]
        else:
            res = xs_f32                                   # exact f32 identity

        o_ref[...] = (h3 + res).astype(o_ref.dtype).reshape(tb, lp, out_c)

    return kernel


def bottleneck_forward(x, params, *, stride, has_res):
    """Fused Bottlrneck forward.  x: (B, Cin, L) float32, PyTorch NCL layout."""
    B, Cin, L = x.shape
    # Single layout pass: NCL -> NLC + static stride slice (fused by XLA).
    xs = jnp.transpose(x, (0, 2, 1))[:, ::stride, :]       # (B, Lp, Cin) f32
    Lp = xs.shape[1]

    MedP = params["w1"].shape[1]
    Out = params["w3"].shape[1]
    if not has_res:
        assert Cin == Out and stride == 1, \
            "identity residual requires Cin == Out and stride == 1"

    # Batch tile: flatten tb*Lp rows into the MXU M dimension (target <=512).
    tb = 1
    for cand in range(1, B + 1):
        if B % cand == 0 and cand * Lp <= 512:
            tb = cand

    kernel = _make_bottleneck_kernel(has_res, tb, Lp, MedP)

    in_arrays = [xs, params["w1"], params["b1"], params["w2"], params["b2"],
                 params["w3"], params["b3"]]
    in_specs = [
        pl.BlockSpec((tb, Lp, Cin), lambda i: (i, 0, 0)),
        pl.BlockSpec((Cin, MedP), lambda i: (0, 0)),
        pl.BlockSpec((1, MedP), lambda i: (0, 0)),
        pl.BlockSpec((3 * MedP, MedP), lambda i: (0, 0)),
        pl.BlockSpec((1, MedP), lambda i: (0, 0)),
        pl.BlockSpec((MedP, Out), lambda i: (0, 0)),
        pl.BlockSpec((1, Out), lambda i: (0, 0)),
    ]
    if has_res:
        in_arrays += [params["wr"], params["br"]]
        in_specs += [pl.BlockSpec((Cin, Out), lambda i: (0, 0)),
                     pl.BlockSpec((1, Out), lambda i: (0, 0))]

    mm_elems = Cin * MedP + 3 * MedP * MedP + MedP * Out + (Cin * Out if has_res else 0)
    cost = pl.CostEstimate(
        flops=2 * B * Lp * mm_elems,
        transcendentals=0,
        bytes_accessed=4 * B * Lp * (Cin + Out) + 2 * mm_elems + 4 * (2 * MedP + 2 * Out),
    )

    out = pl.pallas_call(
        kernel,
        out_shape=jax.ShapeDtypeStruct((B, Lp, Out), jnp.float32),
        grid=(B // tb,),
        in_specs=in_specs,
        out_specs=pl.BlockSpec((tb, Lp, Out), lambda i: (i, 0, 0)),
        compiler_params=pltpu.CompilerParams(
            dimension_semantics=("parallel",)),
        cost_estimate=cost,
    )(*in_arrays)

    return jnp.transpose(out, (0, 2, 1))                   # back to (B, Out, Lp)


# ----------------------------------------------------------------------------
# Parameter construction (PyTorch-layout raw params) + eval-mode BN folding
# ----------------------------------------------------------------------------
def init_raw_params(key, cin, med, cout, has_res):
    ks = jax.random.split(key, 12)

    def conv_w(k_, co, ci, ksz):
        return jax.random.normal(k_, (co, ci, ksz), jnp.float32) * (2.0 / (ci * ksz)) ** 0.5

    def bn_p(k_, c):
        k1, k2, k3, k4 = jax.random.split(k_, 4)
        gamma = 1.0 + 0.1 * jax.random.normal(k1, (c,), jnp.float32)
        beta = 0.1 * jax.random.normal(k2, (c,), jnp.float32)
        mean = 0.1 * jax.random.normal(k3, (c,), jnp.float32)
        var = 1.0 + 0.1 * jax.random.uniform(k4, (c,), jnp.float32)
        return gamma, beta, mean, var

    raw = {
        "c1w": conv_w(ks[0], med, cin, 1),
        "c1b": 0.1 * jax.random.normal(ks[1], (med,), jnp.float32),
        "bn1": bn_p(ks[2], med),
        "c2w": conv_w(ks[3], med, med, 3),
        "c2b": 0.1 * jax.random.normal(ks[4], (med,), jnp.float32),
        "bn2": bn_p(ks[5], med),
        "c3w": conv_w(ks[6], cout, med, 1),
        "c3b": 0.1 * jax.random.normal(ks[7], (cout,), jnp.float32),
        "bn3": bn_p(ks[8], cout),
    }
    if has_res:
        raw["crw"] = conv_w(ks[9], cout, cin, 1)
        raw["crb"] = 0.1 * jax.random.normal(ks[10], (cout,), jnp.float32)
    return raw


def _fold_conv_bn(w, b, bn):
    """(Cout,Cin,k) conv + eval BN -> (k,Cin,Cout) f32 weight, (Cout,) shift."""
    gamma, beta, mean, var = bn
    s = gamma / jnp.sqrt(var + _EPS)
    wf = jnp.transpose(w, (2, 1, 0)) * s[None, None, :]
    shift = (b - mean) * s + beta
    return wf, shift


def fold_params(raw, has_res):
    """Fold BN into bf16 weights + f32 shifts; zero-pad Med to a lane multiple."""
    cin = raw["c1w"].shape[1]
    med = raw["c1w"].shape[0]
    out = raw["c3w"].shape[0]
    medp = _round_up(med, _LANE)
    p = {}

    w1, b1 = _fold_conv_bn(raw["c1w"], raw["c1b"], raw["bn1"])       # (1,cin,med)
    p["w1"] = jnp.zeros((cin, medp), jnp.bfloat16).at[:, :med].set(
        w1[0].astype(jnp.bfloat16))
    p["b1"] = jnp.zeros((1, medp), jnp.float32).at[:, :med].set(b1[None, :])

    w2, b2 = _fold_conv_bn(raw["c2w"], raw["c2b"], raw["bn2"])       # (3,med,med)
    w2p = jnp.zeros((3, medp, medp), jnp.bfloat16).at[:, :med, :med].set(
        w2.astype(jnp.bfloat16))
    p["w2"] = w2p.reshape(3 * medp, medp)                            # taps stacked on K
    p["b2"] = jnp.zeros((1, medp), jnp.float32).at[:, :med].set(b2[None, :])

    w3, b3 = _fold_conv_bn(raw["c3w"], raw["c3b"], raw["bn3"])       # (1,med,out)
    p["w3"] = jnp.zeros((medp, out), jnp.bfloat16).at[:med, :].set(
        w3[0].astype(jnp.bfloat16))
    p["b3"] = b3[None, :].astype(jnp.float32)

    if has_res:
        p["wr"] = jnp.transpose(raw["crw"], (2, 1, 0))[0].astype(jnp.bfloat16)
        p["br"] = raw["crb"][None, :].astype(jnp.float32)
    return p


# ----------------------------------------------------------------------------
# References
# ----------------------------------------------------------------------------
def ref_forward(x, raw, *, stride, has_res):
    """Pure-JAX f32 reference with PyTorch Conv1d / BatchNorm1d(eval) semantics."""
    def conv1d(h, w, b, stride=1, pad=0):
        y = jax.lax.conv_general_dilated(
            h, w, window_strides=(stride,), padding=[(pad, pad)],
            dimension_numbers=("NCH", "OIH", "NCH"))
        return y + b[None, :, None]

    def bn(h, p):
        gamma, beta, mean, var = p
        s = gamma / jnp.sqrt(var + _EPS)
        return (h - mean[None, :, None]) * s[None, :, None] + beta[None, :, None]

    h = jax.nn.relu(bn(conv1d(x, raw["c1w"], raw["c1b"], stride=stride), raw["bn1"]))
    h = jax.nn.relu(bn(conv1d(h, raw["c2w"], raw["c2b"], pad=1), raw["bn2"]))
    h = jax.nn.relu(bn(conv1d(h, raw["c3w"], raw["c3b"]), raw["bn3"]))
    res = conv1d(x, raw["crw"], raw["crb"], stride=stride) if has_res else x
    return h + res


def folded_ref(x, p, *, stride, has_res):
    """Pure-JAX replica of the exact folded/bf16 kernel math (tight check)."""
    xs = jnp.transpose(x, (0, 2, 1))[:, ::stride, :]
    xb = xs.astype(jnp.bfloat16)

    def mm(a, w):
        return jax.lax.dot_general(a, w, (((a.ndim - 1,), (0,)), ((), ())),
                                   preferred_element_type=jnp.float32)

    h1 = jnp.maximum(mm(xb, p["w1"]) + p["b1"], 0.0)
    prev = jnp.pad(h1, ((0, 0), (1, 0), (0, 0)))[:, :-1, :]
    nxt = jnp.pad(h1, ((0, 0), (0, 1), (0, 0)))[:, 1:, :]
    x2 = jnp.concatenate([prev, h1, nxt], axis=-1).astype(jnp.bfloat16)
    h2 = jnp.maximum(mm(x2, p["w2"]) + p["b2"], 0.0)
    h3 = jnp.maximum(mm(h2.astype(jnp.bfloat16), p["w3"]) + p["b3"], 0.0)
    res = (mm(xb, p["wr"]) + p["br"]) if has_res else xs
    return jnp.transpose(h3 + res, (0, 2, 1))


# ----------------------------------------------------------------------------
if __name__ == "__main__":
    key = jax.random.PRNGKey(0)
    kx1, kx2, kp1, kp2 = jax.random.split(key, 4)

    fwd = jax.jit(bottleneck_forward, static_argnames=("stride", "has_res"))

    # Case 1: In != Out, downsample=True -> stride 2 + conv residual branch.
    B, Cin, Med, Cout, L = 2, 64, 32, 128, 32
    x1 = jax.random.normal(kx1, (B, Cin, L), jnp.float32)
    raw1 = init_raw_params(kp1, Cin, Med, Cout, has_res=True)
    p1 = fold_params(raw1, has_res=True)
    out1 = jax.block_until_ready(fwd(x1, p1, stride=2, has_res=True))
    assert out1.shape == (B, Cout, L // 2), out1.shape
    tight1 = float(jnp.max(jnp.abs(out1 - folded_ref(x1, p1, stride=2, has_res=True))))
    assert tight1 < 1e-2, f"case1 folded-path mismatch: {tight1}"
    sem1 = float(jnp.max(jnp.abs(out1 - ref_forward(x1, raw1, stride=2, has_res=True))))
    assert sem1 < 0.1, f"case1 semantic mismatch: {sem1}"

    # Case 2: In == Out -> identity residual (exact f32), stride 1.
    B2, Cin2, Med2, L2 = 2, 128, 32, 16
    x2 = jax.random.normal(kx2, (B2, Cin2, L2), jnp.float32)
    raw2 = init_raw_params(kp2, Cin2, Med2, Cin2, has_res=False)
    p2 = fold_params(raw2, has_res=False)
    out2 = jax.block_until_ready(fwd(x2, p2, stride=1, has_res=False))
    assert out2.shape == (B2, Cin2, L2), out2.shape
    tight2 = float(jnp.max(jnp.abs(out2 - folded_ref(x2, p2, stride=1, has_res=False))))
    assert tight2 < 1e-2, f"case2 folded-path mismatch: {tight2}"
    sem2 = float(jnp.max(jnp.abs(out2 - ref_forward(x2, raw2, stride=1, has_res=False))))
    assert sem2 < 0.1, f"case2 semantic mismatch: {sem2}"

    print("KERNEL_OK")
</pallas_src>

<mosaic_0001>
module attributes {stable_mosaic.version = 11 : i64} {
  func.func @kernel(%arg0: i32, %arg1: memref<2x16x64xf32, #tpu.memory_space<vmem>>, %arg2: memref<64x128xbf16, #tpu.memory_space<vmem>>, %arg3: memref<1x128xf32, #tpu.memory_space<vmem>>, %arg4: memref<384x128xbf16, #tpu.memory_space<vmem>>, %arg5: memref<1x128xf32, #tpu.memory_space<vmem>>, %arg6: memref<128x128xbf16, #tpu.memory_space<vmem>>, %arg7: memref<1x128xf32, #tpu.memory_space<vmem>>, %arg8: memref<64x128xbf16, #tpu.memory_space<vmem>>, %arg9: memref<1x128xf32, #tpu.memory_space<vmem>>, %arg10: memref<2x16x128xf32, #tpu.memory_space<vmem>>) attributes {dimension_semantics = [#tpu.dimension_semantics<parallel>], iteration_bounds = array<i64: 1>, scalar_prefetch = 0 : i64, scratch_operands = 0 : i64, tpu.core_type = #tpu.core_type<tc>, window_params = [{transform_indices = @transform_0, window_bounds = array<i64: 2, 16, 64>}, {pipeline_mode = #tpu.pipeline_mode<synchronous>, transform_indices = @transform_1, window_bounds = array<i64: 64, 128>}, {pipeline_mode = #tpu.pipeline_mode<synchronous>, transform_indices = @transform_2, window_bounds = array<i64: 1, 128>}, {pipeline_mode = #tpu.pipeline_mode<synchronous>, transform_indices = @transform_3, window_bounds = array<i64: 384, 128>}, {pipeline_mode = #tpu.pipeline_mode<synchronous>, transform_indices = @transform_4, window_bounds = array<i64: 1, 128>}, {pipeline_mode = #tpu.pipeline_mode<synchronous>, transform_indices = @transform_5, window_bounds = array<i64: 128, 128>}, {pipeline_mode = #tpu.pipeline_mode<synchronous>, transform_indices = @transform_6, window_bounds = array<i64: 1, 128>}, {pipeline_mode = #tpu.pipeline_mode<synchronous>, transform_indices = @transform_7, window_bounds = array<i64: 64, 128>}, {pipeline_mode = #tpu.pipeline_mode<synchronous>, transform_indices = @transform_8, window_bounds = array<i64: 1, 128>}, {transform_indices = @transform_9, window_bounds = array<i64: 2, 16, 128>}]} {
    %c0 = arith.constant 0 : index
    %c0_0 = arith.constant 0 : index
    %c0_1 = arith.constant 0 : index
    %0 = vector.load %arg1[%c0, %c0_0, %c0_1] : memref<2x16x64xf32, #tpu.memory_space<vmem>>, vector<2x16x64xf32>
    %1 = vector.shape_cast %0 : vector<2x16x64xf32> to vector<32x64xf32>
    %2 = arith.truncf %1 : vector<32x64xf32> to vector<32x64xbf16>
    %c0_2 = arith.constant 0 : index
    %c0_3 = arith.constant 0 : index
    %3 = vector.load %arg2[%c0_2, %c0_3] : memref<64x128xbf16, #tpu.memory_space<vmem>>, vector<64x128xbf16>
    %cst = arith.constant dense<0.000000e+00> : vector<32x128xf32>
    %4 = tpu.matmul %2, %3, %cst {dimension_numbers = #tpu.dot_dimension_numbers<[1], [0], [0], [1], [0, 0, 1, 1], [], []>} : vector<32x64xbf16>, vector<64x128xbf16>, vector<32x128xf32> -> vector<32x128xf32>
    %c0_4 = arith.constant 0 : index
    %c0_5 = arith.constant 0 : index
    %5 = vector.load %arg3[%c0_4, %c0_5] : memref<1x128xf32, #tpu.memory_space<vmem>>, vector<1x128xf32>
    %6 = vector.broadcast %5 : vector<1x128xf32> to vector<32x128xf32>
    %7 = arith.addf %4, %6 : vector<32x128xf32>
    %cst_6 = arith.constant 0.000000e+00 : f32
    %8 = vector.broadcast %cst_6 : f32 to vector<32x128xf32>
    %9 = arith.maximumf %7, %8 : vector<32x128xf32>
    %10 = tpu.iota {dimensions = array<i32: 0>} : vector<32x128xi32>
    %c16_i32 = arith.constant 16 : i32
    %c0_i32 = arith.constant 0 : i32
    %11 = arith.cmpi eq, %c16_i32, %c0_i32 : i32
    %c1_i32 = arith.constant 1 : i32
    %12 = arith.select %11, %c1_i32, %c16_i32 : i32
    %13 = vector.broadcast %12 : i32 to vector<32x128xi32>
    %14 = arith.remsi %10, %13 : vector<32x128xi32>
    %c0_i32_7 = arith.constant 0 : i32
    %15 = vector.broadcast %c0_i32_7 : i32 to vector<32x128xi32>
    %16 = arith.cmpi ne, %14, %15 : vector<32x128xi32>
    %c0_i32_8 = arith.constant 0 : i32
    %17 = vector.broadcast %c0_i32_8 : i32 to vector<32x128xi32>
    %18 = arith.cmpi slt, %14, %17 : vector<32x128xi32>
    %c0_i32_9 = arith.constant 0 : i32
    %19 = arith.cmpi slt, %12, %c0_i32_9 : i32
    %20 = vector.broadcast %19 : i1 to vector<32x128xi1>
    %21 = vector.broadcast %20 : vector<32x128xi1> to vector<32x128xi1>
    %22 = arith.xori %18, %21 : vector<32x128xi1>
    %23 = arith.andi %22, %16 : vector<32x128xi1>
    %24 = vector.broadcast %12 : i32 to vector<32x128xi32>
    %25 = arith.addi %14, %24 : vector<32x128xi32>
    %26 = arith.select %23, %25, %14 : vector<32x128xi1>, vector<32x128xi32>
    %c0_i32_10 = arith.constant 0 : i32
    %27 = vector.broadcast %c0_i32_10 : i32 to vector<32x128xi32>
    %28 = arith.cmpi eq, %26, %27 : vector<32x128xi32>
    %c1_i32_11 = arith.constant 1 : i32
    %29 = tpu.dynamic_rotate %9 by %c1_i32_11 dim 0 : vector<32x128xf32>, i32 -> vector<32x128xf32>
    %cst_12 = arith.constant 0.000000e+00 : f32
    %30 = vector.broadcast %cst_12 : f32 to vector<32x128xf32>
    %31 = arith.select %28, %30, %29 : vector<32x128xi1>, vector<32x128xf32>
    %c15_i32 = arith.constant 15 : i32
    %32 = vector.broadcast %c15_i32 : i32 to vector<32x128xi32>
    %33 = arith.cmpi eq, %26, %32 : vector<32x128xi32>
    %c31_i32 = arith.constant 31 : i32
    %34 = tpu.dynamic_rotate %9 by %c31_i32 dim 0 : vector<32x128xf32>, i32 -> vector<32x128xf32>
    %cst_13 = arith.constant 0.000000e+00 : f32
    %35 = vector.broadcast %cst_13 : f32 to vector<32x128xf32>
    %36 = arith.select %33, %35, %34 : vector<32x128xi1>, vector<32x128xf32>
    %37 = tpu.concatenate %31, %9, %36 in 1 : vector<32x128xf32>, vector<32x128xf32>, vector<32x128xf32> -> vector<32x384xf32>
    %38 = arith.truncf %37 : vector<32x384xf32> to vector<32x384xbf16>
    %c0_14 = arith.constant 0 : index
    %c0_15 = arith.constant 0 : index
    %39 = vector.load %arg4[%c0_14, %c0_15] : memref<384x128xbf16, #tpu.memory_space<vmem>>, vector<384x128xbf16>
    %cst_16 = arith.constant dense<0.000000e+00> : vector<32x128xf32>
    %40 = tpu.matmul %38, %39, %cst_16 {dimension_numbers = #tpu.dot_dimension_numbers<[1], [0], [0], [1], [0, 0, 1, 1], [], []>} : vector<32x384xbf16>, vector<384x128xbf16>, vector<32x128xf32> -> vector<32x128xf32>
    %c0_17 = arith.constant 0 : index
    %c0_18 = arith.constant 0 : index
    %41 = vector.load %arg5[%c0_17, %c0_18] : memref<1x128xf32, #tpu.memory_space<vmem>>, vector<1x128xf32>
    %42 = vector.broadcast %41 : vector<1x128xf32> to vector<32x128xf32>
    %43 = arith.addf %40, %42 : vector<32x128xf32>
    %cst_19 = arith.constant 0.000000e+00 : f32
    %44 = vector.broadcast %cst_19 : f32 to vector<32x128xf32>
    %45 = arith.maximumf %43, %44 : vector<32x128xf32>
    %46 = arith.truncf %45 : vector<32x128xf32> to vector<32x128xbf16>
    %c0_20 = arith.constant 0 : index
    %c0_21 = arith.constant 0 : index
    %47 = vector.load %arg6[%c0_20, %c0_21] : memref<128x128xbf16, #tpu.memory_space<vmem>>, vector<128x128xbf16>
    %cst_22 = arith.constant dense<0.000000e+00> : vector<32x128xf32>
    %48 = tpu.matmul %46, %47, %cst_22 {dimension_numbers = #tpu.dot_dimension_numbers<[1], [0], [0], [1], [0, 0, 1, 1], [], []>} : vector<32x128xbf16>, vector<128x128xbf16>, vector<32x128xf32> -> vector<32x128xf32>
    %c0_23 = arith.constant 0 : index
    %c0_24 = arith.constant 0 : index
    %49 = vector.load %arg7[%c0_23, %c0_24] : memref<1x128xf32, #tpu.memory_space<vmem>>, vector<1x128xf32>
    %50 = vector.broadcast %49 : vector<1x128xf32> to vector<32x128xf32>
    %51 = arith.addf %48, %50 : vector<32x128xf32>
    %cst_25 = arith.constant 0.000000e+00 : f32
    %52 = vector.broadcast %cst_25 : f32 to vector<32x128xf32>
    %53 = arith.maximumf %51, %52 : vector<32x128xf32>
    %c0_26 = arith.constant 0 : index
    %c0_27 = arith.constant 0 : index
    %54 = vector.load %arg8[%c0_26, %c0_27] : memref<64x128xbf16, #tpu.memory_space<vmem>>, vector<64x128xbf16>
    %cst_28 = arith.constant dense<0.000000e+00> : vector<32x128xf32>
    %55 = tpu.matmul %2, %54, %cst_28 {dimension_numbers = #tpu.dot_dimension_numbers<[1], [0], [0], [1], [0, 0, 1, 1], [], []>} : vector<32x64xbf16>, vector<64x128xbf16>, vector<32x128xf32> -> vector<32x128xf32>
    %c0_29 = arith.constant 0 : index
    %c0_30 = arith.constant 0 : index
    %56 = vector.load %arg9[%c0_29, %c0_30] : memref<1x128xf32, #tpu.memory_space<vmem>>, vector<1x128xf32>
    %57 = vector.broadcast %56 : vector<1x128xf32> to vector<32x128xf32>
    %58 = arith.addf %55, %57 : vector<32x128xf32>
    %59 = arith.addf %53, %58 : vector<32x128xf32>
    %60 = vector.shape_cast %59 : vector<32x128xf32> to vector<2x16x128xf32>
    %c0_31 = arith.constant 0 : index
    %c0_32 = arith.constant 0 : index
    %c0_33 = arith.constant 0 : index
    %61 = vector.load %arg10[%c0_31, %c0_32, %c0_33] : memref<2x16x128xf32, #tpu.memory_space<vmem>>, vector<2x16x128xf32>
    tpu.vector_store %arg10[%c0_31, %c0_32, %c0_33], %60 {strides = array<i32>} : memref<2x16x128xf32, #tpu.memory_space<vmem>>, vector<2x16x128xf32>,
    return
  }
  func.func @transform_0(%arg0: i32) -> (i32, i32, i32) {
    %c0_i32 = arith.constant 0 : i32
    %c0_i32_0 = arith.constant 0 : i32
    %c0_i32_1 = arith.constant 0 : i32
    return %arg0, %c0_i32, %c0_i32_0 : i32, i32, i32
  }
  func.func @transform_1(%arg0: i32) -> (i32, i32) {
    %c0_i32 = arith.constant 0 : i32
    %c0_i32_0 = arith.constant 0 : i32
    %c0_i32_1 = arith.constant 0 : i32
    return %c0_i32, %c0_i32_0 : i32, i32
  }
  func.func @transform_2(%arg0: i32) -> (i32, i32) {
    %c0_i32 = arith.constant 0 : i32
    %c0_i32_0 = arith.constant 0 : i32
    %c0_i32_1 = arith.constant 0 : i32
    return %c0_i32, %c0_i32_0 : i32, i32
  }
  func.func @transform_3(%arg0: i32) -> (i32, i32) {
    %c0_i32 = arith.constant 0 : i32
    %c0_i32_0 = arith.constant 0 : i32
    %c0_i32_1 = arith.constant 0 : i32
    return %c0_i32, %c0_i32_0 : i32, i32
  }
  func.func @transform_4(%arg0: i32) -> (i32, i32) {
    %c0_i32 = arith.constant 0 : i32
    %c0_i32_0 = arith.constant 0 : i32
    %c0_i32_1 = arith.constant 0 : i32
    return %c0_i32, %c0_i32_0 : i32, i32
  }
  func.func @transform_5(%arg0: i32) -> (i32, i32) {
    %c0_i32 = arith.constant 0 : i32
    %c0_i32_0 = arith.constant 0 : i32
    %c0_i32_1 = arith.constant 0 : i32
    return %c0_i32, %c0_i32_0 : i32, i32
  }
  func.func @transform_6(%arg0: i32) -> (i32, i32) {
    %c0_i32 = arith.constant 0 : i32
    %c0_i32_0 = arith.constant 0 : i32
    %c0_i32_1 = arith.constant 0 : i32
    return %c0_i32, %c0_i32_0 : i32, i32
  }
  func.func @transform_7(%arg0: i32) -> (i32, i32) {
    %c0_i32 = arith.constant 0 : i32
    %c0_i32_0 = arith.constant 0 : i32
    %c0_i32_1 = arith.constant 0 : i32
    return %c0_i32, %c0_i32_0 : i32, i32
  }
  func.func @transform_8(%arg0: i32) -> (i32, i32) {
    %c0_i32 = arith.constant 0 : i32
    %c0_i32_0 = arith.constant 0 : i32
    %c0_i32_1 = arith.constant 0 : i32
    return %c0_i32, %c0_i32_0 : i32, i32
  }
  func.func @transform_9(%arg0: i32) -> (i32, i32, i32) {
    %c0_i32 = arith.constant 0 : i32
    %c0_i32_0 = arith.constant 0 : i32
    %c0_i32_1 = arith.constant 0 : i32
    return %arg0, %c0_i32, %c0_i32_0 : i32, i32, i32
  }
}

</mosaic_0001>

<bundles_post_ra>
// kernel: bottleneck_forward.1
= control target key start
LH: loop header
LB: loop body
LE: loop exit
PB: predicated region body
PF: predicated region fallthrough
CT: control target
= control target key end

     0   :  { %14 = vsyncpa [#allocation3], 0  ;;  %s1408_s0 = inlined_call_operand.vmem [shape: f32[2,16,64], index: 0, kind: input, shape index: {}]   ;;  %s1409_s1 = inlined_call_operand.hbm [shape: bf16[64,128], index: 1, kind: input, shape index: {}]   ;;  %s1410_s2 = inlined_call_operand.vmem [shape: f32[1,128], index: 2, kind: input, shape index: {}]   ;;  %s1411_s3 = inlined_call_operand.hbm [shape: bf16[384,128], index: 3, kind: input, shape index: {}]   ;;  %s1412_s4 = inlined_call_operand.vmem [shape: f32[1,128], index: 4, kind: input, shape index: {}]   ;;  %s1413_s5 = inlined_call_operand.vmem [shape: bf16[128,128], index: 5, kind: input, shape index: {}]   ;;  %s1414_s6 = inlined_call_operand.hbm [shape: f32[1,128], index: 6, kind: input, shape index: {}]   ;;  %s1415_s7 = inlined_call_operand.vmem [shape: bf16[64,128], index: 7, kind: input, shape index: {}]   ;;  %s1416_s8 = inlined_call_operand.hbm [shape: f32[1,128], index: 8, kind: input, shape index: {}]   ;;  %s1417_s9 = inlined_call_operand.hbm [shape: f32[2,16,128], index: 9, kind: output, shape index: {}]  }
   0x1   :  { %15 = vsyncpa [#allocation6], 0 }
   0x2   :  { %16 = vsyncpa [#allocation9], 0 }
   0x3   :  { %17 = vsyncpa [#allocation4], 0  ;;  %s1185_s30 = smov [#allocation5]   ;;  %s1186_s11 = smov [#allocation2]  }
   0x4   :  { %s39_s10 = sshll.u32 %s1185_s30, 4  ;;  %s25_s12 = sshll.u32 %s1186_s11, 4  ;;  %s40_s10 = int_to_ptr.vmem [resolvable:$true] %s39_s10  ;;  %s1245_s12 = int_to_ptr.vmem [resolvable:$true] %s25_s12 }
   0x5   :  { %s1067_s15 = scalar_lea.hbm %s1411_s3, 3072 }
   0x6   :  { %p1068_p0 = scmp.ne.s32.totalorder %s1411_s3, %s1067_s15  ;;  %p1071_p1 = scmp.lt.u32.totalorder %s1067_s15, %s1411_s3 }
   0x8   :  { %p1073_p2 = pnand %p1071_p1, %p1068_p0 }
   0xa   :  { %1076 = shalt.err (!%p1073_p2)
}
   0xb   :  { %s1077_s20 = scalar_lea.vmem %s40_s10, 3072  ;;  %p1082_p4 = scmp.lt.s32.totalorder %s40_s10, %s40_s10 }
   0xc   :  { %p1078_p3 = scmp.ne.s32.totalorder %s40_s10, %s1077_s20  ;;  %p1083_p5 = scmp.lt.s32.totalorder %s1077_s20, %s1077_s20 }
   0xe   :  { %p1084_p6 = por %p1083_p5, %p1082_p4 }
  0x10   :  { %p1085_p7 = pnand %p1084_p6, %p1078_p3 }
  0x12   :  { %1088 = shalt.err (!%p1085_p7)
}
  0x13   :  { %s1187_s21 = smov 64   ;;  %s1188_s22 = smov 4  }
  0x14   :  { %45 = dma.hbm_to_vmem [thread:$0]  %s1411_s3, 3072, %s40_s10, [#allocation6], %s1187_s21, %s1187_s21, %s1188_s22  }
  0x15   :  { %s1089_s27 = scalar_lea.hbm %s1409_s1, 512 }
  0x16   :  { %p1090_p8 = scmp.ne.s32.totalorder %s1409_s1, %s1089_s27  ;;  %p1093_p9 = scmp.lt.u32.totalorder %s1089_s27, %s1409_s1 }
  0x18   :  { %p1095_p10 = pnand %p1093_p9, %p1090_p8 }
  0x1a   :  { %1098 = shalt.err (!%p1095_p10)
}
  0x1b   :  { %s1099_s13 = scalar_lea.vmem %s1245_s12, 512  ;;  %p1104_p12 = scmp.lt.s32.totalorder %s1245_s12, %s1245_s12 }
  0x1c   :  { %p1100_p11 = scmp.ne.s32.totalorder %s1245_s12, %s1099_s13  ;;  %p1105_p13 = scmp.lt.s32.totalorder %s1099_s13, %s1099_s13 }
  0x1e   :  { %p1106_p0 = por %p1105_p13, %p1104_p12 }
  0x20   :  { %p1107_p1 = pnand %p1106_p0, %p1100_p11 }
  0x22   :  { %1110 = shalt.err (!%p1107_p1)
}
  0x23   :  { %31 = dma.hbm_to_vmem [thread:$0]  %s1409_s1, 512, %s1245_s12, [#allocation3], %s1187_s21, %s1187_s21, %s1188_s22  }
  0x24   :  { %s1189_s14 = smov [#allocation7]   ;;  %s1190_s16 = smov [#allocation8]  }
  0x25   :  { %s56_s15 = sshll.u32 %s1189_s14, 4  ;;  %s68_s17 = sshll.u32 %s1190_s16, 4  ;;  %s57_s15 = int_to_ptr.vmem [resolvable:$true] %s56_s15  ;;  %s69_s17 = int_to_ptr.vmem [resolvable:$true] %s68_s17 }
  0x26   :  { %s1111_s20 = scalar_lea.hbm %s1414_s6, 16 }
  0x27   :  { %p1112_p2 = scmp.ne.s32.totalorder %s1414_s6, %s1111_s20  ;;  %p1115_p3 = scmp.lt.u32.totalorder %s1111_s20, %s1414_s6 }
  0x29   :  { %p1117_p4 = pnand %p1115_p3, %p1112_p2 }
  0x2b   :  { %1120 = shalt.err (!%p1117_p4)
}
  0x2c   :  { %s1121_s1 = scalar_lea.vmem %s57_s15, 16  ;;  %s1125_s12 = scalar_lea.vmem %s57_s15, 32 }
  0x2d   :  { %p1122_p5 = scmp.ne.s32.totalorder %s57_s15, %s1121_s1  ;;  %p1126_p6 = scmp.lt.s32.totalorder %s57_s15, %s57_s15 }
  0x2e   :  { %p1127_p7 = scmp.lt.s32.totalorder %s1125_s12, %s1121_s1 }
  0x30   :  { %p1128_p8 = por %p1127_p7, %p1126_p6 }
  0x32   :  { %p1129_p9 = pnand %p1128_p8, %p1122_p5 }
  0x34   :  { %1132 = shalt.err (!%p1129_p9)
}
  0x35   :  { %59 = dma.hbm_to_vmem [thread:$0]  %s1414_s6, 16, %s57_s15, [#allocation6]  }
  0x36   :  { %s1133_s29 = scalar_lea.hbm %s1416_s8, 16 }
  0x37   :  { %p1134_p10 = scmp.ne.s32.totalorder %s1416_s8, %s1133_s29  ;;  %p1137_p11 = scmp.lt.u32.totalorder %s1133_s29, %s1416_s8 }
  0x39   :  { %p1139_p12 = pnand %p1137_p11, %p1134_p10 }
  0x3b   :  { %1142 = shalt.err (!%p1139_p12)
}
  0x3c   :  { %s1143_s10 = scalar_lea.vmem %s69_s17, 16  ;;  %s1147_s14 = scalar_lea.vmem %s69_s17, 32 }
  0x3d   :  { %p1144_p13 = scmp.ne.s32.totalorder %s69_s17, %s1143_s10  ;;  %p1148_p0 = scmp.lt.s32.totalorder %s69_s17, %s69_s17 }
  0x3e   :  { %p1149_p1 = scmp.lt.s32.totalorder %s1147_s14, %s1143_s10 }
  0x40   :  { %p1150_p2 = por %p1149_p1, %p1148_p0 }
  0x42   :  { %p1151_p3 = pnand %p1150_p2, %p1144_p13 }
  0x44   :  { %1154 = shalt.err (!%p1151_p3)
}
  0x45   :  { %71 = dma.hbm_to_vmem [thread:$0]  %s1416_s8, 16, %s69_s17, [#allocation9]  }
  0x46   :  { %1177 = dma.done.wait [#allocation3], 512  }
  0x47   :  { %1178 = vsyncadd [#allocation3], 4294966784 }
  0x48   :  { %1179 = dma.done.wait [#allocation6], 3088  }
  0x49   :  { %1180 = vsyncadd [#allocation6], 4294964208 }
  0x4a   :  { %1181 = dma.done.wait [#allocation9], 16  }
  0x4b   :  { %1182 = vsyncadd [#allocation9], 4294967280  ;;  %v1027_v0 = vld [vmem:[#allocation2] sm:$0xff]   ;;  %v1028_v1 = vld [vmem:[#allocation2 + $0x8] sm:$0xff]   ;;  %vm130_vm0 = vcmask 523264   ;;  %v190_v35 = vlaneseq  ;;  %vm1191_vm6 = vmmov 1  }
  0x4c   :  { %953 = vmatprep.subr.bf16.mxu0 %v1027_v0  ;;  %v1029_v2 = vld [vmem:[#allocation2 + $0x10] sm:$0xff]   ;;  %v85_v3 = vld [vmem:[%s1408_s0] sm:$0xff]  ;;  %v86_v4 = vld [vmem:[%s1408_s0 + $0x8] sm:$0xff] }
  0x4d   :  { %954 = vmatpush3.bf16.msra.mxu0 %v1027_v0  ;;  %v1306_v5 = vpack.c.bf16 %v86_v4, %v85_v3  ;;  %v1031_v6 = vld [vmem:[#allocation5 + $0x40] sm:$0xff]   ;;  %v1030_v8 = vld [vmem:[#allocation2 + $0x18] sm:$0xff]   ;;  %v87_v9 = vld [vmem:[%s1408_s0 + $0x10] sm:$0xff]  ;;  %v191_v36 = vshrl.u32 %v190_v35, 7 }
  0x4e   :  { %955 = vmatprep.subr.bf16.mxu0 %v1028_v1  ;;  %v1032_v7 = vld [vmem:[#allocation5] sm:$0xff]   ;;  %899 = vmatprep.subr.bf16.mxu1 %v1031_v6  ;;  %v88_v10 = vld [vmem:[%s1408_s0 + $0x18] sm:$0xff]  ;;  %v1034_v11 = vld [vmem:[#allocation5 + $0x48] sm:$0xff]  }
  0x4f   :  { %961 = vmatprep.mubr.msk.bf16.mxu0 %vm130_vm0, %v1306_v5  ;;  %900 = vmatpush3.bf16.msra.mxu1 %v1032_v7  ;;  %v1035_v12 = vld [vmem:[#allocation5 + $0x8] sm:$0xff]   ;;  %v1033_v13 = vld [vmem:[#allocation5 + $0x80] sm:$0xff]   ;;  %v1037_v14 = vld [vmem:[#allocation5 + $0x50] sm:$0xff]   ;;  %v1316_v16 = vpack.c.bf16 %v88_v10, %v87_v9  ;;  %v192_v37 = vadd.s32 8, %v191_v36  ;;  %v194_v40 = vadd.s32 24, %v191_v36  ;;  %v199_v43 = vand.u32 15, %v191_v36 }
  0x50   :  { %901 = vmatprep.subr.bf16.mxu1 %v1034_v11  ;;  %v1038_v15 = vld [vmem:[#allocation5 + $0x10] sm:$0xff]   ;;  %v1040_v17 = vld [vmem:[#allocation5 + $0x58] sm:$0xff]   ;;  %v1036_v18 = vld [vmem:[#allocation5 + $0x88] sm:$0xff]   ;;  %vm268_vm1 = vcmp.lt.s32.totalorder %v191_v36, 7  ;;  %vm251_vm2 = vcmp.lt.s32.totalorder %v191_v36, 1  ;;  %v193_v56 = vadd.s32 16, %v191_v36 }
  0x51   :  { %956 = vmatpush3.bf16.msra.mxu0 %v1028_v1  ;;  %v1041_v19 = vld [vmem:[#allocation5 + $0x18] sm:$0xff]   ;;  %v1043_v20 = vld [vmem:[#allocation5 + $0x60] sm:$0xff]   ;;  %v1039_v21 = vld [vmem:[#allocation5 + $0x90] sm:$0xff]   ;;  %v206_v44 = vand.u32 15, %v192_v37  ;;  %v220_v52 = vand.u32 15, %v194_v40  ;;  %vm1326_vm3 = vcmp.ne.s32.totalorder %v199_v43, 0 }
  0x52   :  { %957 = vmatprep.subr.bf16.mxu0 %v1029_v2  ;;  %v1044_v22 = vld [vmem:[#allocation5 + $0x20] sm:$0xff]   ;;  %v1042_v23 = vld [vmem:[#allocation5 + $0x98] sm:$0xff]   ;;  %v1046_v25 = vld [vmem:[#allocation5 + $0x68] sm:$0xff]  }
  0x53   :  { %902 = vmatpush3.bf16.msra.mxu1 %v1035_v12  ;;  %v1045_v24 = vld [vmem:[#allocation5 + $0xa0] sm:$0xff]   ;;  %v1047_v26 = vld [vmem:[#allocation5 + $0x28] sm:$0xff]   ;;  %v1049_v28 = vld [vmem:[#allocation5 + $0x70] sm:$0xff]   ;;  %vm1330_vm4 = vcmp.ne.s32.totalorder %v206_v44, 15  ;;  %vm1334_vm5 = vcmp.ne.s32.totalorder %v220_v52, 15 }
  0x54   :  { %903 = vmatprep.subr.bf16.mxu1 %v1037_v14  ;;  %v1048_v27 = vld [vmem:[#allocation5 + $0xa8] sm:$0xff]   ;;  %v1050_v29 = vld [vmem:[#allocation5 + $0x30] sm:$0xff]   ;;  %v1052_v31 = vld [vmem:[#allocation5 + $0x78] sm:$0xff]  }
  0x55   :  { %958 = vmatpush3.bf16.msra.mxu0 %v1029_v2  ;;  %v1051_v30 = vld [vmem:[#allocation5 + $0xb0] sm:$0xff]   ;;  %v1053_v32 = vld [vmem:[#allocation5 + $0x38] sm:$0xff]   ;;  %v1055_v34 = vld [vmem:[%s1413_s5] sm:$0xff]  }
  0x56   :  { %959 = vmatprep.subr.bf16.mxu0 %v1030_v8  ;;  %v1054_v33 = vld [vmem:[#allocation5 + $0xb8] sm:$0xff]   ;;  %v825_v38 = vld [vmem:[%s1410_s2] ss:$0 sm:$0xff]  ;;  %vm858_vm7 = vmpackc.low %vm1191_vm6, %vm1326_vm3 }
  0x57   :  { %904 = vmatpush3.bf16.msra.mxu1 %v1038_v15  ;;  %vm866_vm8 = vmpackc.low %vm1330_vm4, %vm1191_vm6 }
  0x58   :  { %905 = vmatprep.subr.bf16.mxu1 %v1040_v17  ;;  %vm870_vm9 = vmpackc.low %vm1334_vm5, %vm1191_vm6  ;;  %v213_v17 = vand.u32 15, %v193_v56 }
  0x59   :  { %960 = vmatpush3.bf16.msra.mxu0 %v1030_v8 }
  0x5a   :  { %965 = vmatprep.subr.bf16.mxu0 %v1033_v13  ;;  %vm890_vm10 = vcmp.ne.s32.totalorder %v213_v17, 0 }
  0x5b   :  { %906 = vmatpush3.bf16.msra.mxu1 %v1041_v19  ;;  %vm862_vm11 = vmpackc.low %vm1191_vm6, %vm890_vm10 }
  0x5c   :  { %962 = vmatmul.mubr.msk.bf16.vlgmr.msra.gmra.mrb[0].mxu0 %vm130_vm0, %v1316_v16  ;;  %907 = vmatprep.subr.bf16.mxu1 %v1043_v20  ;;  %v1056_v20 = vld [vmem:[%s1413_s5 + $0x8] sm:$0xff]  }
  0x5d   :  { %966 = vmatpush3.bf16.msra.mxu0 %v1033_v13 }
  0x5e   :  { %967 = vmatprep.subr.bf16.mxu0 %v1036_v18 }
  0x5f   :  { %908 = vmatpush3.bf16.msra.mxu1 %v1044_v22  ;;  %v1058_v22 = vld [vmem:[%s1413_s5 + $0x18] sm:$0xff]  }
  0x60   :  { %909 = vmatprep.subr.bf16.mxu1 %v1046_v25  ;;  %v1062_v25 = vld [vmem:[%s1413_s5 + $0x28] sm:$0xff]  }
  0x61   :  { %968 = vmatpush3.bf16.msra.mxu0 %v1036_v18 }
  0x62   :  { %969 = vmatprep.subr.bf16.mxu0 %v1039_v21 }
  0x63   :  { %910 = vmatpush3.bf16.msra.mxu1 %v1047_v26  ;;  %v1063_v26 = vld [vmem:[%s1415_s7 + $0x10] sm:$0xff]  }
  0x64   :  { %911 = vmatprep.subr.bf16.mxu1 %v1049_v28  ;;  %v1065_v28 = vld [vmem:[%s1415_s7 + $0x18] sm:$0xff]  }
  0x65   :  { %970 = vmatpush3.bf16.msra.mxu0 %v1039_v21  ;;  %v1057_v21 = vld [vmem:[%s1413_s5 + $0x10] sm:$0xff]  }
  0x66   :  { %971 = vmatprep.subr.bf16.mxu0 %v1042_v23 }
  0x67   :  { %912 = vmatpush3.bf16.msra.mxu1 %v1050_v29  ;;  %v1066_v29 = vld [vmem:[%s1413_s5 + $0x38] sm:$0xff]  }
  0x68   :  { %913 = vmatprep.subr.bf16.mxu1 %v1052_v31 }
  0x69   :  { %972 = vmatpush3.bf16.msra.mxu0 %v1042_v23  ;;  %v1060_v23 = vld [vmem:[%s1413_s5 + $0x20] sm:$0xff]  }
  0x6a   :  { %973 = vmatprep.subr.bf16.mxu0 %v1045_v24 }
  0x6b   :  { %914 = vmatpush3.bf16.msra.mxu1 %v1053_v32 }
  0x6c   :  { %985 = vmatprep.subr.bf16.mxu1 %v1055_v34 }
  0x6d   :  { %974 = vmatpush3.bf16.msra.mxu0 %v1045_v24  ;;  %v1061_v24 = vld [vmem:[%s1415_s7 + $0x8] sm:$0xff]  }
  0x6e   :  { %975 = vmatprep.subr.bf16.mxu0 %v1048_v27 }
  0x71   :  { %976 = vmatpush3.bf16.msra.mxu0 %v1048_v27  ;;  %v1064_v27 = vld [vmem:[%s1413_s5 + $0x30] sm:$0xff]  }
  0x72   :  { %977 = vmatprep.subr.bf16.mxu0 %v1051_v30 }
  0x75   :  { %978 = vmatpush3.bf16.msra.mxu0 %v1051_v30 }
  0x76   :  { %979 = vmatprep.subr.bf16.mxu0 %v1054_v33 }
  0x79   :  { %980 = vmatpush3.bf16.msra.mxu0 %v1054_v33  ;;  %v832_v33 = vld [vmem:[%s1412_s4] ss:$0 sm:$0xff]  ;;  %s1192_s4 = smov [#allocation10]  }
  0x7a   :  { %s811_s5 = sshll.u32 %s1192_s4, 4  ;;  %s812_s5 = int_to_ptr.vmem [resolvable:$true] %s811_s5 }
  0x7b   :  { %p1160_p5 = scmp.lt.s32.totalorder %s812_s5, %s812_s5 }
 0x12f   :  { %v963_v39 = vpop.f32.mrb[0].mxu0 }
 0x130   :  { %v180_v41 = vadd.f32 %v963_v39, %v825_v38  ;;  %v171_v42 = vpop.f32.mrb[1].mxu0 }
 0x131   :  { %v172_v45 = vadd.f32 %v825_v38, %v171_v42  ;;  %v964_v46 = vpop.f32.mrb[2].mxu0 }
 0x132   :  { %v188_v47 = vmax.f32 %v180_v41, 0.0  ;;  %v183_v48 = vadd.f32 %v964_v46, %v825_v38  ;;  %v174_v49 = vpop.f32.mrb[3].mxu0 }
 0x133   :  { %v186_v50 = vmax.f32 %v172_v45, 0.0  ;;  %v175_v51 = vadd.f32 %v825_v38, %v174_v49 }
 0x134   :  { %v189_v53 = vmax.f32 %v183_v48, 0.0  ;;  %v249_v57 = vrot.slane %v188_v47, 7  ;;  %v266_v61 = vrot.slane %v188_v47, 1 }
 0x135   :  { %v247_v58 = vrot.slane %v186_v50, 7  ;;  %v264_v59 = vrot.slane %v186_v50, 1  ;;  %v187_v60 = vmax.f32 %v175_v51, 0.0 }
 0x136   :  { %v250_v62 = vrot.slane %v189_v53, 7  ;;  %v267_v63 = vrot.slane %v189_v53, 1  ;;  %v281_v0 = vpack.c.bf16 %v189_v53, %v188_v47 }
 0x137   :  { %v248_v1 = vrot.slane %v187_v60, 7  ;;  %v265_v2 = vrot.slane %v187_v60, 1  ;;  %v278_v3 = vpack.c.bf16 %v187_v60, %v186_v50 }
 0x138   :  { %v269_v6 = vsel %vm268_vm1, %v266_v61, %v267_v63  ;;  %v272_v7 = vsel %vm268_vm1, %v267_v63, %v264_v59  ;;  %v255_v8 = vsel %vm251_vm2, %v250_v62, %v247_v58  ;;  %v252_v9 = vsel %vm251_vm2, %v249_v57, %v250_v62 }
 0x139   :  { %v871_v10 = vpack.c.bf16 %v272_v7, %v269_v6  ;;  %514 = vmatprep.mubr.bf16.mxu1 %v278_v3  ;;  %v254_v11 = vsel %vm251_vm2, %v247_v58, %v248_v1  ;;  %v270_v12 = vsel %vm268_vm1, %v265_v2, %v266_v61  ;;  %v271_v13 = vsel %vm268_vm1, %v264_v59, %v265_v2 }
 0x13a   :  { %v859_v14 = vpack.c.bf16 %v254_v11, %v255_v8  ;;  %v867_v15 = vpack.c.bf16 %v270_v12, %v271_v13  ;;  %v253_v18 = vsel %vm251_vm2, %v248_v1, %v249_v57  ;;  %v873_v1 = vld [vmem:[#allocation7] ss:$0 sm:$0xff] }
 0x13b   :  { %v863_v19 = vpack.c.bf16 %v252_v9, %v253_v18 }
 0x13c   :  { %860 = vmatmul.mubr.msk.bf16.vlgmr.msra.gmra.mrb[0].mxu1 %vm858_vm7, %v859_v14  ;;  %981 = vmatprep.mubr.msk.bf16.mxu0 %vm866_vm8, %v867_v15 }
 0x13d   :  { %522 = vmatprep.mubr.bf16.mxu1 %v281_v0  ;;  %982 = vmatmul.mubr.msk.bf16.vlgmr.msra.gmra.mrb[4].mxu0 %vm870_vm9, %v871_v10  ;;  %v882_v0 = vld [vmem:[#allocation8] ss:$0 sm:$0xff] }
 0x13e   :  { %986 = vmatpush3.bf16.msra.mxu1 %v1055_v34  ;;  %1013 = vmatprep.mubr.msk.bf16.mxu0 %vm130_vm0, %v1306_v5  ;;  %v1059_v5 = vld [vmem:[%s1415_s7] sm:$0xff]   ;;  %s1155_s7 = scalar_lea.vmem %s812_s5, 512 }
 0x13f   :  { %987 = vmatprep.subr.bf16.mxu1 %v1056_v20  ;;  %1005 = vmatprep.subr.bf16.mxu0 %v1059_v5  ;;  %p1156_p4 = scmp.ne.s32.totalorder %s812_s5, %s1155_s7  ;;  %p1161_p6 = scmp.lt.s32.totalorder %s1155_s7, %s1155_s7 }
 0x140   :  { %1006 = vmatpush3.bf16.msra.mxu0 %v1059_v5 }
 0x141   :  { %1007 = vmatprep.subr.bf16.mxu0 %v1061_v24  ;;  %p1162_p7 = por %p1161_p6, %p1160_p5 }
 0x142   :  { %988 = vmatpush3.bf16.msra.mxu1 %v1056_v20 }
 0x143   :  { %989 = vmatprep.subr.bf16.mxu1 %v1057_v21  ;;  %p1163_p8 = pnand %p1162_p7, %p1156_p4 }
 0x144   :  { %864 = vmatmul.mubr.msk.bf16.gmra.mrb[4].mxu1 %vm862_vm11, %v863_v19  ;;  %1008 = vmatpush3.bf16.msra.mxu0 %v1061_v24 }
 0x145   :  { %1009 = vmatprep.subr.bf16.mxu0 %v1063_v26 }
 0x146   :  { %990 = vmatpush3.bf16.msra.mxu1 %v1057_v21 }
 0x147   :  { %991 = vmatprep.subr.bf16.mxu1 %v1058_v22 }
 0x148   :  { %1010 = vmatpush3.bf16.msra.mxu0 %v1063_v26 }
 0x149   :  { %1011 = vmatprep.subr.bf16.mxu0 %v1065_v28 }
 0x14a   :  { %992 = vmatpush3.bf16.msra.mxu1 %v1058_v22 }
 0x14b   :  { %993 = vmatprep.subr.bf16.mxu1 %v1060_v23 }
 0x14c   :  { %1012 = vmatpush3.bf16.msra.mxu0 %v1065_v28 }
 0x14e   :  { %994 = vmatpush3.bf16.msra.mxu1 %v1060_v23 }
 0x14f   :  { %995 = vmatprep.subr.bf16.mxu1 %v1062_v25  ;;  %1014 = vmatmul.mubr.msk.bf16.vlgmr.msra.gmra.mrb[8].mxu0 %vm130_vm0, %v1316_v16 }
 0x152   :  { %996 = vmatpush3.bf16.msra.mxu1 %v1062_v25 }
 0x153   :  { %997 = vmatprep.subr.bf16.mxu1 %v1064_v27 }
 0x156   :  { %998 = vmatpush3.bf16.msra.mxu1 %v1064_v27 }
 0x157   :  { %999 = vmatprep.subr.bf16.mxu1 %v1066_v29 }
 0x15a   :  { %1000 = vmatpush3.bf16.msra.mxu1 %v1066_v29 }
 0x20f   :  { %v915_v30 = vpop.f32.mrb[0].mxu1 }
 0x210   :  { %v916_v31 = vpop.f32.mrb[1].mxu1  ;;  %v983_v32 = vpop.f32.mrb[4].mxu0 }
 0x211   :  { %v917_v34 = vadd.f32 %v916_v31, %v915_v30  ;;  %v918_v35 = vpop.f32.mrb[2].mxu1  ;;  %v565_v36 = vpop.f32.mrb[5].mxu0 }
 0x212   :  { %v919_v37 = vpop.f32.mrb[3].mxu1  ;;  %v984_v38 = vpop.f32.mrb[6].mxu0 }
 0x213   :  { %v517_v39 = vadd.f32 %v917_v34, %v832_v33  ;;  %v920_v40 = vadd.f32 %v919_v37, %v918_v35  ;;  %v568_v41 = vpop.f32.mrb[7].mxu0 }
 0x215   :  { %v566_v42 = vadd.f32 %v565_v36, %v517_v39  ;;  %v520_v43 = vadd.f32 %v920_v40, %v832_v33 }
 0x217   :  { %v569_v44 = vadd.f32 %v568_v41, %v520_v43  ;;  %v921_v45 = vpop.f32.mrb[4].mxu1  ;;  %v580_v46 = vmax.f32 %v566_v42, 0.0 }
 0x218   :  { %v922_v16 = vpop.f32.mrb[5].mxu1 }
 0x219   :  { %v581_v47 = vmax.f32 %v569_v44, 0.0  ;;  %v923_v48 = vadd.f32 %v922_v16, %v921_v45  ;;  %v924_v49 = vpop.f32.mrb[6].mxu1 }
 0x21a   :  { %v925_v50 = vpop.f32.mrb[7].mxu1 }
 0x21b   :  { %v584_v51 = vpack.c.bf16 %v581_v47, %v580_v46  ;;  %v525_v52 = vadd.f32 %v923_v48, %v832_v33  ;;  %v926_v53 = vadd.f32 %v925_v50, %v924_v49 }
 0x21d   :  { %v574_v54 = vadd.f32 %v983_v32, %v525_v52  ;;  %v528_v55 = vadd.f32 %v926_v53, %v832_v33  ;;  %1001 = vmatprep.mubr.bf16.mxu1 %v584_v51 }
 0x21f   :  { %v577_v56 = vadd.f32 %v984_v38, %v528_v55  ;;  %v582_v57 = vmax.f32 %v574_v54, 0.0 }
 0x221   :  { %v583_v58 = vmax.f32 %v577_v56, 0.0 }
 0x222   :  { %v1015_v60 = vpop.f32.mrb[8].mxu0 }
 0x223   :  { %v585_v59 = vpack.c.bf16 %v583_v58, %v582_v57  ;;  %v783_v61 = vpop.f32.mrb[9].mxu0  ;;  %v792_v3 = vadd.f32 %v1015_v60, %v882_v0 }
 0x224   :  { %v1016_v62 = vpop.f32.mrb[10].mxu0  ;;  %v784_v7 = vadd.f32 %v882_v0, %v783_v61 }
 0x225   :  { %1002 = vmatmul.mubr.bf16.vlgmr.msra.gmra.mrb[8].mxu1 %v585_v59  ;;  %v786_v63 = vpop.f32.mrb[11].mxu0  ;;  %v795_v17 = vadd.f32 %v1016_v62, %v882_v0 }
 0x226   :  { %v787_v20 = vadd.f32 %v882_v0, %v786_v63 }
 0x2f8   :  { %v1003_v2 = vpop.f32.mrb[8].mxu1 }
 0x2f9   :  { %v700_v4 = vadd.f32 %v1003_v2, %v873_v1  ;;  %v691_v6 = vpop.f32.mrb[9].mxu1 }
 0x2fa   :  { %v692_v8 = vadd.f32 %v873_v1, %v691_v6  ;;  %v1004_v9 = vpop.f32.mrb[10].mxu1 }
 0x2fb   :  { %v708_v10 = vmax.f32 %v700_v4, 0.0  ;;  %v703_v11 = vadd.f32 %v1004_v9, %v873_v1  ;;  %v694_v12 = vpop.f32.mrb[11].mxu1 }
 0x2fc   :  { %v706_v13 = vmax.f32 %v692_v8, 0.0  ;;  %v695_v14 = vadd.f32 %v873_v1, %v694_v12 }
 0x2fd   :  { %v800_v15 = vadd.f32 %v792_v3, %v708_v10  ;;  %v709_v18 = vmax.f32 %v703_v11, 0.0 }
 0x2fe   :  { %v798_v19 = vadd.f32 %v784_v7, %v706_v13  ;;  %v707_v21 = vmax.f32 %v695_v14, 0.0 }
 0x2ff   :  { %804 = vst [vmem:[#allocation10 + $0x10] sm:$0xff] %v800_v15  ;;  %v801_v22 = vadd.f32 %v795_v17, %v709_v18 }
 0x300   :  { %802 = vst [vmem:[#allocation10] sm:$0xff] %v798_v19  ;;  %v799_v5 = vadd.f32 %v787_v20, %v707_v21 }
 0x301   :  { %805 = vst [vmem:[#allocation10 + $0x18] sm:$0xff] %v801_v22 }
 0x302   :  { %803 = vst [vmem:[#allocation10 + $0x8] sm:$0xff] %v799_v5 }
 0x303   :  { %1166 = shalt.err (!%p1163_p8)
}
 0x304   :  { %s1167_s1 = scalar_lea.hbm %s1417_s9, 512 }
 0x305   :  { %p1168_p9 = scmp.ne.s32.totalorder %s1417_s9, %s1167_s1  ;;  %p1171_p10 = scmp.lt.u32.totalorder %s1167_s1, %s1417_s9 }
 0x307   :  { %p1173_p11 = pnand %p1171_p10, %p1168_p9 }
 0x309   :  { %1176 = shalt.err (!%p1173_p11)
}
 0x30a   :  { %s1193_s27 = smov 128   ;;  %s1194_s28 = smov 8  }
 0x30b   :  { %817 = dma.vmem_to_hbm [thread:$0]  %s812_s5, 512, %s1417_s9, [#allocation4], %s1193_s27, %s1193_s27, %s1194_s28  }
 0x30c   :  { %1183 = dma.done.wait [#allocation4], 512  }
 0x30d   :  { %1184 = vsyncadd [#allocation4], 4294966784 }
 0x30e   :  { %821 = vsyncpa [#allocation3], 1 }
 0x30f   :  { %822 = vsyncpa [#allocation6], 1 }
 0x310   :  { %823 = vsyncpa [#allocation9], 1 }
 0x311   :  { %824 = vsyncpa [#allocation4], 1 }

</bundles_post_ra>
